<compile_context>
chip_gen: v7x
topology: tpu7x:2x2x1
jax: 0.10.0
libtpu: 0.0.40
codegen_flags: <defaults>
</compile_context>

<pallas_src>
import jax
import jax.numpy as jnp
from jax.experimental import pallas as pl
from jax.experimental.pallas import tpu as pltpu


LANE = 128


def _round_up(x, m):
    return ((x + m - 1) // m) * m


def _pad2d(x, rows, cols):
    r, c = x.shape
    return jnp.pad(x, ((0, rows - r), (0, cols - c)))


def _pad_nodes(n):
    n_pad = _round_up(max(n, LANE), LANE)
    if n_pad >= 512:
        n_pad = _round_up(n_pad, 256)     # room for 256-wide row/K tiles on v6e/v7x
    return n_pad


def _pick_tile(dim):
    # v5e MXU is 4x(128x128); v6e/v7x are 2x(256x256).  256-wide tiles once the padded
    # extent reaches 512 (review: 128 tiles under-fill v6e/v7x and sit low on the HBM
    # roofline); small extents use the full dim (single tile).
    if dim <= 128:
        return dim
    if dim >= 512 and dim % 256 == 0:
        return 256
    return 128


def _vmem_limit_bytes():
    # Derive the scoped-VMEM budget per chip generation (v7x: 64 MiB physical, half of
    # v5e/v6e's 128 MiB).  Conservative: half the physical capacity, capped at 32 MiB.
    cap = 64 * 1024 * 1024
    try:
        cap = int(getattr(pltpu.get_tpu_info(), "vmem_capacity_bytes", cap))
    except Exception:
        pass
    return max(16 * 1024 * 1024, min(cap // 2, 32 * 1024 * 1024))


_VMEM_LIMIT = _vmem_limit_bytes()


# ----------------------------- Pallas kernels ------------------------------

def _weave_layer_kernel(a_ref, x_ref, w_ref, b_ref, o_ref, xw_ref):
    """Fused WeaveLayer atom update:  o = relu(A_hat @ (x @ W) + b).

    Grid = (row tiles,), traversed sequentially ("arbitrary").  The XW pre-projection is
    computed once on the first grid step into a persistent VMEM scratch (x and W are
    resident blocks), so XW never touches HBM and there is no separate dense kernel.
    The K (column) axis of A_hat is collapsed: each step consumes a full row stripe.
    """
    @pl.when(pl.program_id(0) == 0)
    def _():
        xw_ref[...] = jnp.dot(
            x_ref[...], w_ref[...], preferred_element_type=jnp.float32
        ).astype(xw_ref.dtype)

    r = jnp.dot(a_ref[...], xw_ref[...], preferred_element_type=jnp.float32)
    r = r + b_ref[...]
    o_ref[...] = jnp.maximum(r, 0.0).astype(o_ref.dtype)


def _concat_gather_kernel(x_ref, w_ref, b_ref, m_ref, memb_ref, o_ref, acc_ref):
    """Fused WeaveConcat + WeaveGather:

        c   = tanh(x @ Wc + bc)                          (per row tile, cast to bf16)
        out = (onehot(membership) * atom_mask) @ c       (accumulated across row tiles)

    The one-hot is built in-kernel from the membership row slice (lane-dense (1, tm)
    block), so it is never materialized in HBM and the per-atom concat activation never
    leaves VMEM.  Padded atoms carry membership = -1 and mask = 0, so they contribute 0.
    """
    i = pl.program_id(0)

    @pl.when(i == 0)
    def _():
        acc_ref[...] = jnp.zeros_like(acc_ref)

    c = jnp.dot(x_ref[...], w_ref[...], preferred_element_type=jnp.float32)
    c = jnp.tanh(c + b_ref[...]).astype(jnp.bfloat16)

    b_pad = acc_ref.shape[0]
    tm = x_ref.shape[0]
    mol = jax.lax.broadcasted_iota(jnp.int32, (b_pad, tm), 0)
    onehot = (mol == memb_ref[...]).astype(jnp.float32) * m_ref[...]
    acc_ref[...] += jnp.dot(onehot.astype(jnp.bfloat16), c,
                            preferred_element_type=jnp.float32)

    @pl.when(i == pl.num_programs(0) - 1)
    def _():
        o_ref[...] = acc_ref[...].astype(o_ref.dtype)


def _concat_kernel(x_ref, w_ref, b_ref, m_ref, o_ref):
    """Standalone WeaveConcat (fallback when not followed by WeaveGather):
       o = tanh(x @ Wc + bc) * atom_mask, per row tile."""
    c = jnp.dot(x_ref[...], w_ref[...], preferred_element_type=jnp.float32)
    c = jnp.tanh(c + b_ref[...]) * m_ref[...]
    o_ref[...] = c.astype(o_ref.dtype)


def _gather_kernel(x_ref, memb_ref, o_ref, acc_ref):
    """Standalone WeaveGather (fallback): sum-pool atoms into molecules via an
    in-kernel one-hot, accumulated across row tiles."""
    i = pl.program_id(0)

    @pl.when(i == 0)
    def _():
        acc_ref[...] = jnp.zeros_like(acc_ref)

    b_pad = acc_ref.shape[0]
    tm = x_ref.shape[0]
    mol = jax.lax.broadcasted_iota(jnp.int32, (b_pad, tm), 0)
    onehot = (mol == memb_ref[...]).astype(jnp.bfloat16)
    acc_ref[...] += jnp.dot(onehot, x_ref[...], preferred_element_type=jnp.float32)

    @pl.when(i == pl.num_programs(0) - 1)
    def _():
        o_ref[...] = acc_ref[...].astype(o_ref.dtype)


# ----------------------------- kernel wrappers ------------------------------

def weave_layer_pallas(a_hat_bf16, x_bf16, w_bf16, b):
    n_pad = a_hat_bf16.shape[0]
    f_in = x_bf16.shape[1]
    f_out = w_bf16.shape[1]
    tm = _pick_tile(n_pad)

    # Collapsed-K working set (double buffering counted for the pipelined streams).
    need = (2 * tm * n_pad * 2          # A_hat row stripe, bf16, 2 buffers
            + 2 * n_pad * f_in * 2      # x resident
            + 2 * f_in * f_out * 2      # W resident
            + n_pad * f_out * 2         # XW scratch (persistent)
            + 2 * tm * f_out * 2        # output tile
            + (2 << 20))                # headroom
    if need > _VMEM_LIMIT:
        # TODO(synk): K-tiled / block-sparse A_hat path for graphs whose row stripe does
        # not fit in scoped VMEM.
        raise NotImplementedError("graph too large for the K-resident WeaveLayer kernel")

    b2 = b.reshape(1, f_out).astype(jnp.float32)
    return pl.pallas_call(
        _weave_layer_kernel,
        out_shape=jax.ShapeDtypeStruct((n_pad, f_out), jnp.bfloat16),
        grid=(n_pad // tm,),
        in_specs=[
            pl.BlockSpec((tm, n_pad), lambda i: (i, 0)),     # A_hat row stripe
            pl.BlockSpec((n_pad, f_in), lambda i: (0, 0)),   # x (resident block)
            pl.BlockSpec((f_in, f_out), lambda i: (0, 0)),   # W (resident block)
            pl.BlockSpec((1, f_out), lambda i: (0, 0)),      # bias
        ],
        out_specs=pl.BlockSpec((tm, f_out), lambda i: (i, 0)),
        scratch_shapes=[pltpu.VMEM((n_pad, f_out), jnp.bfloat16)],   # persistent XW
        compiler_params=pltpu.CompilerParams(
            dimension_semantics=("arbitrary",),   # XW scratch written on step 0 -> sequential
            vmem_limit_bytes=_VMEM_LIMIT,
        ),
    )(a_hat_bf16, x_bf16, w_bf16, b2)


def concat_gather_pallas(x_bf16, w_bf16, b, mask_pad, membership_pad, n_mols):
    n_pad, f_in = x_bf16.shape
    f_out = w_bf16.shape[1]
    tm = _pick_tile(n_pad)
    b_pad = _round_up(max(n_mols, 8), 8)
    b2 = b.reshape(1, f_out).astype(jnp.float32)
    m2 = mask_pad.reshape(1, n_pad).astype(jnp.float32)
    memb2 = membership_pad.reshape(1, n_pad).astype(jnp.int32)
    return pl.pallas_call(
        _concat_gather_kernel,
        out_shape=jax.ShapeDtypeStruct((b_pad, f_out), jnp.float32),
        grid=(n_pad // tm,),
        in_specs=[
            pl.BlockSpec((tm, f_in), lambda i: (i, 0)),      # atom features
            pl.BlockSpec((f_in, f_out), lambda i: (0, 0)),   # Wc (resident)
            pl.BlockSpec((1, f_out), lambda i: (0, 0)),      # bias
            pl.BlockSpec((1, tm), lambda i: (0, i)),         # atom mask (lane-dense row)
            pl.BlockSpec((1, tm), lambda i: (0, i)),         # membership (lane-dense row)
        ],
        out_specs=pl.BlockSpec((b_pad, f_out), lambda i: (0, 0)),
        scratch_shapes=[pltpu.VMEM((b_pad, f_out), jnp.float32)],
        compiler_params=pltpu.CompilerParams(
            dimension_semantics=("arbitrary",),   # cross-row-tile accumulator
            vmem_limit_bytes=_VMEM_LIMIT,
        ),
    )(x_bf16, w_bf16, b2, m2, memb2)


def concat_pallas(x_bf16, w_bf16, b, mask_pad):
    n_pad, f_in = x_bf16.shape
    f_out = w_bf16.shape[1]
    tm = _pick_tile(n_pad)
    b2 = b.reshape(1, f_out).astype(jnp.float32)
    m2 = mask_pad.reshape(n_pad, 1).astype(jnp.float32)
    return pl.pallas_call(
        _concat_kernel,
        out_shape=jax.ShapeDtypeStruct((n_pad, f_out), jnp.bfloat16),
        grid=(n_pad // tm,),
        in_specs=[
            pl.BlockSpec((tm, f_in), lambda i: (i, 0)),
            pl.BlockSpec((f_in, f_out), lambda i: (0, 0)),
            pl.BlockSpec((1, f_out), lambda i: (0, 0)),
            pl.BlockSpec((tm, 1), lambda i: (i, 0)),
        ],
        out_specs=pl.BlockSpec((tm, f_out), lambda i: (i, 0)),
        compiler_params=pltpu.CompilerParams(
            dimension_semantics=("parallel",),
            vmem_limit_bytes=_VMEM_LIMIT,
        ),
    )(x_bf16, w_bf16, b2, m2)


def gather_pallas(x_bf16, membership_pad, n_mols):
    n_pad, f = x_bf16.shape
    tm = _pick_tile(n_pad)
    b_pad = _round_up(max(n_mols, 8), 8)
    memb2 = membership_pad.reshape(1, n_pad).astype(jnp.int32)
    return pl.pallas_call(
        _gather_kernel,
        out_shape=jax.ShapeDtypeStruct((b_pad, f), jnp.float32),
        grid=(n_pad // tm,),
        in_specs=[
            pl.BlockSpec((tm, f), lambda i: (i, 0)),
            pl.BlockSpec((1, tm), lambda i: (0, i)),
        ],
        out_specs=pl.BlockSpec((b_pad, f), lambda i: (0, 0)),
        scratch_shapes=[pltpu.VMEM((b_pad, f), jnp.float32)],
        compiler_params=pltpu.CompilerParams(
            dimension_semantics=("arbitrary",),
            vmem_limit_bytes=_VMEM_LIMIT,
        ),
    )(x_bf16, memb2)


# -------------------------- graph glue (plain JAX) --------------------------

def _build_a_hat(pair_index, n, n_pad):
    """Dense symmetric-normalised aggregation operator, padded to (n_pad, n_pad), f32.

    Scatter construction is plain-JAX glue (not a Pallas hot path).  The adjacency is
    symmetrized explicitly so one-directional edge lists normalize correctly; self-loops
    are added with jnp.maximum against I so duplicates never double-count the diagonal.
    """
    adj = jnp.zeros((n, n), jnp.float32)
    adj = adj.at[pair_index[1], pair_index[0]].set(1.0)
    adj = jnp.maximum(adj, adj.T)
    adj = jnp.maximum(adj, jnp.eye(n, dtype=jnp.float32))
    deg = jnp.sum(adj, axis=1)
    d_inv_sqrt = jax.lax.rsqrt(deg)
    a_hat = adj * d_inv_sqrt[:, None] * d_inv_sqrt[None, :]
    return _pad2d(a_hat, n_pad, n_pad)


def _init_dense(key, in_dim, out_dim):
    """Uniform(+-1/sqrt(in)) weights, zero-padded so every lane dim is a multiple of 128."""
    in_pad = _round_up(in_dim, LANE)
    out_pad = _round_up(out_dim, LANE)
    kw, kb = jax.random.split(key)
    scale = 1.0 / jnp.sqrt(jnp.float32(in_dim))
    w = jax.random.uniform(kw, (in_dim, out_dim), jnp.float32, minval=-scale, maxval=scale)
    b = jax.random.uniform(kb, (out_dim,), jnp.float32, minval=-scale, maxval=scale)
    w_pad = _pad2d(w, in_pad, out_pad)
    b_pad = jnp.pad(b, (0, out_pad - out_dim))
    return w_pad, w_pad.astype(jnp.bfloat16), b_pad, in_pad, out_pad


# ------------------------------ layer classes -------------------------------

class WeaveLayer:
    """Atom-stream Weave/graph-conv update:  x' = relu(A_hat @ (x @ W) + b), one fused kernel."""

    def __init__(self, key, in_dim, out_dim):
        (self.w, self.w_bf16, self.b,
         self.in_pad, self.out_pad) = _init_dense(key, in_dim, out_dim)

    def __call__(self, x_pad_bf16, pair_features, a_hat_bf16):
        x_new = weave_layer_pallas(a_hat_bf16, x_pad_bf16, self.w_bf16, self.b)
        # TODO(synk): pair-feature update branch (atom->pair gather over pair_index and
        # pair->pair dense) is not defined by the container spec; pair features pass through.
        return x_new, pair_features


class WeaveConcat:
    """Per-atom readout prep:  x' = tanh(x @ Wc + bc) * atom_mask."""

    def __init__(self, key, in_dim, out_dim):
        (self.w, self.w_bf16, self.b,
         self.in_pad, self.out_pad) = _init_dense(key, in_dim, out_dim)

    def __call__(self, x_pad_bf16, atom_mask_pad):
        return concat_pallas(x_pad_bf16, self.w_bf16, self.b, atom_mask_pad)


class WeaveGather:
    """Sum-pool atoms into molecules via membership (one-hot built in-kernel)."""

    def __init__(self, n_mols):
        self.n_mols = n_mols

    def __call__(self, x_pad_bf16, membership_pad):
        return gather_pallas(x_pad_bf16, membership_pad, self.n_mols)


class SequentialWeaveGraph:
    """Mirrors the PyTorch SequentialWeaveGraph dispatch loop.  Adjacent
    WeaveConcat -> WeaveGather pairs are executed through the fused concat+gather kernel."""

    def __init__(self):
        self.layers = []

    def add(self, layer):
        self.layers.append(layer)

    def forward(self, x, pair_features, pair_index, atom_mask=None, membership=None):
        n, f_in = x.shape
        n_pad = _pad_nodes(n)
        f_pad = _round_up(f_in, LANE)

        # Build the dense normalized aggregation operator once from pair_index (glue),
        # cast to bf16 for the MXU (f32 accumulation happens inside the kernels).
        a_hat_bf16 = _build_a_hat(pair_index, n, n_pad).astype(jnp.bfloat16)

        x_pad = _pad2d(x, n_pad, f_pad).astype(jnp.bfloat16)
        if atom_mask is None:
            atom_mask = jnp.ones((n,), jnp.float32)
        mask_pad = jnp.zeros((n_pad,), jnp.float32).at[:n].set(atom_mask)
        if membership is None:
            membership = jnp.zeros((n,), jnp.int32)
        membership_pad = jnp.full((n_pad,), -1, jnp.int32).at[:n].set(membership)

        i = 0
        while i < len(self.layers):
            layer = self.layers[i]
            if isinstance(layer, WeaveLayer):
                # (A_hat stands in for pair_index: it is precomputed from it once above.)
                x_pad, pair_features = layer(x_pad, pair_features, a_hat_bf16)
            elif isinstance(layer, WeaveConcat):
                if i + 1 < len(self.layers) and isinstance(self.layers[i + 1], WeaveGather):
                    gather = self.layers[i + 1]
                    x_pad = concat_gather_pallas(x_pad, layer.w_bf16, layer.b,
                                                 mask_pad, membership_pad, gather.n_mols)
                    i += 1   # WeaveGather consumed by the fused kernel
                else:
                    x_pad = layer(x_pad, mask_pad)
            elif isinstance(layer, WeaveGather):
                x_pad = layer(x_pad, membership_pad)
            else:
                x_pad = layer(x_pad)
            i += 1
        return x_pad

    __call__ = forward


# ---------------------------------- main ------------------------------------

if __name__ == "__main__":
    key = jax.random.PRNGKey(0)
    k_x, k_p, k_l1, k_l2, k_c = jax.random.split(key, 5)

    N_ATOMS = 200   # padded to 256 rows -> 2 row tiles per kernel (exercises the pl.when paths)
    F_IN = 16       # padded to 128 lanes
    HID = 64        # padded to 128 lanes
    F_OUT = 32      # padded to 128 lanes
    N_MOLS = 4      # molecules (gather rows padded to 8)

    # Node (atom) features.
    x = jax.random.normal(k_x, (N_ATOMS, F_IN), jnp.float32)

    # Deterministic ring graph (bidirectional), pair_index shape (2, E).
    src = jnp.arange(N_ATOMS, dtype=jnp.int32)
    dst = (src + 1) % N_ATOMS
    pair_index = jnp.concatenate(
        [jnp.stack([src, dst], axis=0), jnp.stack([dst, src], axis=0)], axis=1)
    pair_features = jax.random.normal(k_p, (pair_index.shape[1], 8), jnp.float32)
    atom_mask = jnp.ones((N_ATOMS,), jnp.float32)
    membership = (jnp.arange(N_ATOMS, dtype=jnp.int32) * N_MOLS) // N_ATOMS

    model = SequentialWeaveGraph()
    model.add(WeaveLayer(k_l1, F_IN, HID))
    model.add(WeaveLayer(k_l2, HID, HID))
    model.add(WeaveConcat(k_c, HID, F_OUT))
    model.add(WeaveGather(N_MOLS))

    out_pad = model(x, pair_features, pair_index,
                    atom_mask=atom_mask, membership=membership)
    out_pad = jax.block_until_ready(out_pad)
    out = out_pad[:N_MOLS, :F_OUT]

    # ---------------- pure-JAX reference (mirrors the bf16 rounding) ----------------
    def to_bf(v):
        return v.astype(jnp.bfloat16).astype(jnp.float32)

    HI = jax.lax.Precision.HIGHEST
    n_pad = _pad_nodes(N_ATOMS)
    a_bf = to_bf(_build_a_hat(pair_index, N_ATOMS, n_pad))
    h = to_bf(_pad2d(x, n_pad, _round_up(F_IN, LANE)))
    mask_pad = jnp.zeros((n_pad,), jnp.float32).at[:N_ATOMS].set(atom_mask)
    memb_pad = jnp.full((n_pad,), -1, jnp.int32).at[:N_ATOMS].set(membership)

    for lyr in model.layers[:2]:
        xw = to_bf(jnp.dot(h, to_bf(lyr.w), precision=HI))
        h = to_bf(jnp.maximum(jnp.dot(a_bf, xw, precision=HI) + lyr.b, 0.0))
    cc = model.layers[2]
    c = to_bf(jnp.tanh(jnp.dot(h, to_bf(cc.w), precision=HI) + cc.b))
    b_pad = _round_up(max(N_MOLS, 8), 8)
    onehot = ((jnp.arange(b_pad, dtype=jnp.int32)[:, None] == memb_pad[None, :])
              .astype(jnp.float32) * mask_pad[None, :])
    ref = jnp.dot(to_bf(onehot), c, precision=HI)[:N_MOLS, :F_OUT]

    assert out.shape == (N_MOLS, F_OUT)
    assert bool(jnp.allclose(out, ref, atol=5e-2, rtol=5e-2)), (
        "max abs diff = %f" % float(jnp.max(jnp.abs(out - ref))))

    print("KERNEL_OK")
</pallas_src>

<mosaic_0001>
module attributes {stable_mosaic.version = 11 : i64} {
  func.func @_weave_layer_kernel(%arg0: i32, %arg1: memref<128x256xbf16, #tpu.memory_space<vmem>>, %arg2: memref<256x128xbf16, #tpu.memory_space<vmem>>, %arg3: memref<128x128xbf16, #tpu.memory_space<vmem>>, %arg4: memref<1x128xf32, #tpu.memory_space<vmem>>, %arg5: memref<128x128xbf16, #tpu.memory_space<vmem>>, %arg6: memref<256x128xbf16, #tpu.memory_space<vmem>>) attributes {dimension_semantics = [#tpu.dimension_semantics<arbitrary>], iteration_bounds = array<i64: 2>, scalar_prefetch = 0 : i64, scratch_operands = 1 : i64, tpu.core_type = #tpu.core_type<tc>, window_params = [{transform_indices = @transform_0, window_bounds = array<i64: 128, 256>}, {pipeline_mode = #tpu.pipeline_mode<synchronous>, transform_indices = @transform_1, window_bounds = array<i64: 256, 128>}, {pipeline_mode = #tpu.pipeline_mode<synchronous>, transform_indices = @transform_2, window_bounds = array<i64: 128, 128>}, {pipeline_mode = #tpu.pipeline_mode<synchronous>, transform_indices = @transform_3, window_bounds = array<i64: 1, 128>}, {transform_indices = @transform_4, window_bounds = array<i64: 128, 128>}]} {
    %c0_i32 = arith.constant 0 : i32
    %0 = arith.cmpi eq, %arg0, %c0_i32 : i32
    %1 = arith.extui %0 : i1 to i32
    %c0_i32_0 = arith.constant 0 : i32
    %2 = arith.cmpi ne, %1, %c0_i32_0 : i32
    scf.if %2 {
      %c0_9 = arith.constant 0 : index
      %c0_10 = arith.constant 0 : index
      %13 = vector.load %arg2[%c0_9, %c0_10] : memref<256x128xbf16, #tpu.memory_space<vmem>>, vector<256x128xbf16>
      %c0_11 = arith.constant 0 : index
      %c0_12 = arith.constant 0 : index
      %14 = vector.load %arg3[%c0_11, %c0_12] : memref<128x128xbf16, #tpu.memory_space<vmem>>, vector<128x128xbf16>
      %cst_13 = arith.constant dense<0.000000e+00> : vector<256x128xf32>
      %15 = tpu.matmul %13, %14, %cst_13 {dimension_numbers = #tpu.dot_dimension_numbers<[1], [0], [0], [1], [0, 0, 1, 1], [], []>} : vector<256x128xbf16>, vector<128x128xbf16>, vector<256x128xf32> -> vector<256x128xf32>
      %16 = arith.truncf %15 : vector<256x128xf32> to vector<256x128xbf16>
      %c0_14 = arith.constant 0 : index
      %c0_15 = arith.constant 0 : index
      %17 = vector.load %arg6[%c0_14, %c0_15] : memref<256x128xbf16, #tpu.memory_space<vmem>>, vector<256x128xbf16>
      tpu.vector_store %arg6[%c0_14, %c0_15], %16 {strides = array<i32>} : memref<256x128xbf16, #tpu.memory_space<vmem>>, vector<256x128xbf16>,
    } else {
    }
    %c0 = arith.constant 0 : index
    %c0_1 = arith.constant 0 : index
    %3 = vector.load %arg1[%c0, %c0_1] : memref<128x256xbf16, #tpu.memory_space<vmem>>, vector<128x256xbf16>
    %c0_2 = arith.constant 0 : index
    %c0_3 = arith.constant 0 : index
    %4 = vector.load %arg6[%c0_2, %c0_3] : memref<256x128xbf16, #tpu.memory_space<vmem>>, vector<256x128xbf16>
    %cst = arith.constant dense<0.000000e+00> : vector<128x128xf32>
    %5 = tpu.matmul %3, %4, %cst {dimension_numbers = #tpu.dot_dimension_numbers<[1], [0], [0], [1], [0, 0, 1, 1], [], []>} : vector<128x256xbf16>, vector<256x128xbf16>, vector<128x128xf32> -> vector<128x128xf32>
    %c0_4 = arith.constant 0 : index
    %c0_5 = arith.constant 0 : index
    %6 = vector.load %arg4[%c0_4, %c0_5] : memref<1x128xf32, #tpu.memory_space<vmem>>, vector<1x128xf32>
    %7 = vector.broadcast %6 : vector<1x128xf32> to vector<128x128xf32>
    %8 = arith.addf %5, %7 : vector<128x128xf32>
    %cst_6 = arith.constant 0.000000e+00 : f32
    %9 = vector.broadcast %cst_6 : f32 to vector<128x128xf32>
    %10 = arith.maximumf %8, %9 : vector<128x128xf32>
    %11 = arith.truncf %10 : vector<128x128xf32> to vector<128x128xbf16>
    %c0_7 = arith.constant 0 : index
    %c0_8 = arith.constant 0 : index
    %12 = vector.load %arg5[%c0_7, %c0_8] : memref<128x128xbf16, #tpu.memory_space<vmem>>, vector<128x128xbf16>
    tpu.vector_store %arg5[%c0_7, %c0_8], %11 {strides = array<i32>} : memref<128x128xbf16, #tpu.memory_space<vmem>>, vector<128x128xbf16>,
    return
  }
  func.func @transform_0(%arg0: i32) -> (i32, i32) {
    %c0_i32 = arith.constant 0 : i32
    %c0_i32_0 = arith.constant 0 : i32
    return %arg0, %c0_i32 : i32, i32
  }
  func.func @transform_1(%arg0: i32) -> (i32, i32) {
    %c0_i32 = arith.constant 0 : i32
    %c0_i32_0 = arith.constant 0 : i32
    %c0_i32_1 = arith.constant 0 : i32
    return %c0_i32, %c0_i32_0 : i32, i32
  }
  func.func @transform_2(%arg0: i32) -> (i32, i32) {
    %c0_i32 = arith.constant 0 : i32
    %c0_i32_0 = arith.constant 0 : i32
    %c0_i32_1 = arith.constant 0 : i32
    return %c0_i32, %c0_i32_0 : i32, i32
  }
  func.func @transform_3(%arg0: i32) -> (i32, i32) {
    %c0_i32 = arith.constant 0 : i32
    %c0_i32_0 = arith.constant 0 : i32
    %c0_i32_1 = arith.constant 0 : i32
    return %c0_i32, %c0_i32_0 : i32, i32
  }
  func.func @transform_4(%arg0: i32) -> (i32, i32) {
    %c0_i32 = arith.constant 0 : i32
    %c0_i32_0 = arith.constant 0 : i32
    return %arg0, %c0_i32 : i32, i32
  }
}

</mosaic_0001>

<bundles_post_ra>
// kernel: tpu_custom_call.1
= control target key start
LH: loop header
LB: loop body
LE: loop exit
PB: predicated region body
PF: predicated region fallthrough
CT: control target
= control target key end

     0   :  { %9 = vsyncpa [#allocation4], 0  ;;  %s1969_s0 = inlined_call_operand.hbm [shape: bf16[256,256], index: 0, kind: input, shape index: {}]   ;;  %s1970_s1 = inlined_call_operand.hbm [shape: bf16[256,128], index: 1, kind: input, shape index: {}]   ;;  %s1971_s2 = inlined_call_operand.hbm [shape: bf16[128,128], index: 2, kind: input, shape index: {}]   ;;  %s1972_s3 = inlined_call_operand.vmem [shape: f32[1,128], index: 3, kind: input, shape index: {}]   ;;  %s1973_s4 = inlined_call_operand.hbm [shape: bf16[256,128], index: 4, kind: output, shape index: {}]  }
   0x1   :  { %11 = vsyncpa [#allocation4 + $0x1], 0 }
   0x2   :  { %12 = vsyncpa [#allocation7], 0 }
   0x3   :  { %13 = vsyncpa [#allocation5], 0 }
   0x4   :  { %15 = vsyncpa [#allocation5 + $0x1], 0  ;;  %s1681_s15 = smov 0   ;;  %s1683_s16 = smov 0  }
   0x5   :  { %s1685_s17 = smov 0   ;;  %s1687_s18 = smov 0  }
   0x6 LB: > { %s1702_s19 = sadd.s32 4294967295, %s1644_s18   ;;  %s1056_s20 = sadd.s32 4294967294, %s1644_s18   ;;  %s1644_s18 = sphi %s1687_s18, %s1994_s18   ;;  %s1640_s17 = sphi %s1685_s17, %s1993_s17   ;;  %s1636_s16 = sphi %s1683_s16, %s1992_s16   ;;  %s1632_s15 = sphi %s1681_s15, %s1991_s15  }
   0x7   : > { %p41_p0 = scmp.ne.s32.totalorder %s1636_s16, %s1632_s15  ;;  %p1974_p1 = scmp.eq.s32.totalorder %s1702_s19, 0 }
   0x8   : > { %p134_p3 = scmp.eq.s32.totalorder %s1056_s20, 1  ;;  %p1057_p5 = scmp.ge.s32.totalorder %s1644_s18, 1 }
   0x9   : > { %p1711_p4 = por %p1974_p1, %p41_p0  ;;  %p141_p7 = scmp.lt.s32.totalorder %s1644_s18, 3 }
   0xa   : > { %p1716_p6 = por %p134_p3, %p41_p0  ;;  %s1646_s24 = smov [#allocation6]  }
   0xb   : > { %s1977_s21 = scalar_select %p1711_p4, 1, 0 }
   0xc   : > { %s1978_s22 = scalar_select %p1716_p6, 1, 0 }
   0xd   : > { %p1722_p9 = pnand %p1057_p5, %p141_p7  ;;  %s153_s25 = sshll.u32 %s1646_s24, 4  ;;  %s1726_s25 = int_to_ptr.vmem [resolvable:$true] %s153_s25 }
   0xe   : > { %s1647_s27 = smov [#allocation8]   ;;  %s1488_s5 = scalar_lea.hbm %s1970_s1, 2048 }
   0xf   : > { %p1379_p10 = pneg %p1722_p9  ;;  %s166_s28 = sshll.u32 %s1647_s27, 4  ;;  %s1737_s28 = int_to_ptr.vmem [resolvable:$true] %s166_s28 }
  0x10   : > { %p1489_p13 = scmp.ne.s32.totalorder %s1970_s1, %s1488_s5  ;;  %p1495_p7 = scmp.lt.u32.totalorder %s1488_s5, %s1970_s1 }
  0x11   : > { %p1733_p12 = pnand %p1379_p10, %p1974_p1 }
  0x13   : > { %p1490_p0 = pneg %p1733_p12 }
  0x15   : > { %p1491_p3 = pnand %p1490_p0, %p1489_p13 }
  0x17   : > { %p1492_p5 = pneg %p1491_p3 }
  0x19   : > { %p1497_p10 = pnand %p1495_p7, %p1492_p5 }
  0x1b   : > { %1500 = shalt.err (!%p1497_p10)
}
  0x1c   : > { %s1501_s10 = scalar_lea.vmem %s1726_s25, 2048  ;;  %p1509_p2 = scmp.lt.s32.totalorder %s1726_s25, %s1726_s25 }
  0x1d   : > { %p1502_p11 = scmp.ne.s32.totalorder %s1726_s25, %s1501_s10  ;;  %p1510_p13 = scmp.lt.s32.totalorder %s1501_s10, %s1501_s10 }
  0x1f   : > { %p1504_p8 = pnand %p1502_p11, %p1490_p0  ;;  %p1511_p3 = por %p1510_p13, %p1509_p2 }
  0x21   : > { %p1505_p1 = pneg %p1504_p8 }
  0x23   : > { %p1512_p6 = pnand %p1511_p3, %p1505_p1 }
  0x25   : > { %1515 = shalt.err (!%p1512_p6)
}
  0x26   : > { %s1648_s11 = smov 64   ;;  %s1649_s12 = smov 4  }
  0x27   : > { %1382 = dma.hbm_to_vmem [thread:$0]  (!%p1733_p12), %s1970_s1, 2048, %s1726_s25, [#allocation7], %s1648_s11, %s1648_s11, %s1649_s12  }
  0x28   : > { %s1516_s27 = scalar_lea.hbm %s1971_s2, 1024 }
  0x29   : > { %p1517_p2 = scmp.ne.s32.totalorder %s1971_s2, %s1516_s27  ;;  %p1523_p8 = scmp.lt.u32.totalorder %s1516_s27, %s1971_s2 }
  0x2b   : > { %p1519_p1 = pnand %p1517_p2, %p1490_p0 }
  0x2d   : > { %p1520_p6 = pneg %p1519_p1 }
  0x2f   : > { %p1525_p11 = pnand %p1523_p8, %p1520_p6 }
  0x31   : > { %1528 = shalt.err (!%p1525_p11)
}
  0x32   : > { %s1529_s25 = scalar_lea.vmem %s1737_s28, 1024  ;;  %p1537_p13 = scmp.lt.s32.totalorder %s1737_s28, %s1737_s28 }
  0x33   : > { %p1530_p5 = scmp.ne.s32.totalorder %s1737_s28, %s1529_s25  ;;  %p1538_p3 = scmp.lt.s32.totalorder %s1529_s25, %s1529_s25 }
  0x35   : > { %p1532_p7 = pnand %p1530_p5, %p1490_p0  ;;  %p1539_p2 = por %p1538_p3, %p1537_p13 }
  0x37   : > { %p1533_p10 = pneg %p1532_p7 }
  0x39   : > { %p1540_p1 = pnand %p1539_p2, %p1533_p10 }
  0x3b   : > { %1543 = shalt.err (!%p1540_p1)
}
  0x3c   : > { %1385 = dma.hbm_to_vmem [thread:$0]  (!%p1733_p12), %s1971_s2, 1024, %s1737_s28, [#allocation7], %s1648_s11, %s1648_s11, %s1649_s12  }
  0x3d   : > { %s1792_s9 = sadd.s32 1, %s1644_s18   ;;  %s28_s26 = sadd.s32 1, %s1640_s17 }
  0x3e   : > { %s25_s10 = ssub.s32 %s1644_s18, %s1792_s9  ;;  %p35_p0 = scmp.ne.s32.totalorder %s1640_s17, %s1636_s16 }
  0x3f   : > { %p26_p6 = scmp.eq.s32.totalorder %s25_s10, 0  ;;  %p36_p8 = scmp.eq.s32.totalorder %s1644_s18, 0 }
  0x40   : > { %p1981_p11 = scmp.eq.s32.totalorder %s1702_s19, 1  ;;  %p1396_p7 = scmp.lt.s32.totalorder %s1644_s18, 2 }
  0x41   : > { %s1808_s14 = scalar_select %p26_p6, %s1640_s17, %s28_s26  }
  0x42   : > { %p1802_p5 = por %p1981_p11, %p35_p0  ;;  %p37_p10 = por %p36_p8, %p35_p0 }
  0x43   : > { %s183_s20 = sand.u32 1, %s1640_s17   ;;  %s1134_s28 = sshll.u32 %s1644_s18, 11 }
  0x44   : > { %s1982_s13 = scalar_select %p1802_p5, 1, 0 }
  0x45   : > { %s1061_s24 = sshll.u32 %s183_s20, 7  ;;  %s1815_s27 = scalar_lea.hbm %s1969_s0, %s1134_s28 }
  0x46   : > { %s187_s29 = scalar_lea.vmem [#allocation3], %s1061_s24  ;;  %p1819_p12 = pnand %p1396_p7, %p37_p10 }
  0x47   : > { %s195_s30 = sshll.u32 %s187_s29, 4  ;;  %s1823_s6 = scalar_lea.sflag [#allocation4], %s183_s20  ;;  %s1817_s30 = int_to_ptr.vmem [resolvable:$true] %s195_s30 }
  0x48   : > { %s1544_s25 = scalar_lea.hbm %s1815_s27, 2048  ;;  %p1546_p3 = pneg %p1819_p12 }
  0x49   : > { %p1545_p13 = scmp.ne.s32.totalorder %s1815_s27, %s1544_s25  ;;  %s1549_s26 = scalar_lea.hbm %s1969_s0, 4096 }
  0x4a   : > { %p1550_p0 = scmp.lt.u32.totalorder %s1815_s27, %s1969_s0  ;;  %p1551_p6 = scmp.lt.u32.totalorder %s1549_s26, %s1544_s25 }
  0x4b   : > { %p1547_p2 = pnand %p1546_p3, %p1545_p13  ;;  %p1553_p11 = scmp.lt.u32.totalorder %s1544_s25, %s1815_s27 }
  0x4c   : > { %p1552_p8 = por %p1551_p6, %p1550_p0 }
  0x4d   : > { %p1548_p1 = pneg %p1547_p2 }
  0x4e   : > { %p1554_p7 = por %p1553_p11, %p1552_p8 }
  0x50   : > { %p1555_p10 = pnand %p1554_p7, %p1548_p1 }
  0x52   : > { %1558 = shalt.err (!%p1555_p10)
}
  0x53   : > { %s1559_s20 = scalar_lea.vmem %s1817_s30, 2048  ;;  %s1650_s28 = smov [#allocation3]  }
  0x54   : > { %p1560_p13 = scmp.ne.s32.totalorder %s1817_s30, %s1559_s20  ;;  %s1564_s11 = sshll.u32 %s1650_s28, 4  ;;  %s1565_s11 = int_to_ptr.vmem [resolvable:$false] %s1564_s11 }
  0x55   : > { %s1566_s12 = scalar_lea.vmem %s1565_s11, 4096  ;;  %p1567_p4 = scmp.lt.s32.totalorder %s1817_s30, %s1565_s11 }
  0x56   : > { %p1562_p2 = pnand %p1560_p13, %p1546_p3  ;;  %p1568_p0 = scmp.lt.s32.totalorder %s1566_s12, %s1559_s20 }
  0x58   : > { %p1563_p5 = pneg %p1562_p2  ;;  %p1569_p6 = por %p1568_p0, %p1567_p4 }
  0x5a   : > { %p1570_p8 = pnand %p1569_p6, %p1563_p5 }
  0x5c   : > { %1573 = shalt.err (!%p1570_p8)
}
  0x5d   : > { %s1651_s29 = smov 128   ;;  %s1652_s25 = smov 8  }
  0x5e   : > { %1389 = dma.hbm_to_vmem [thread:$0]  (!%p1819_p12), %s1815_s27, 2048, %s1817_s30, %s1823_s6, %s1651_s29, %s1651_s29, %s1652_s25  }
  0x5f   : > { %207 = sbr.rel (%p1722_p9) target bundleno = 678 (0x2a6), region = 36  ;;  %s1854_s7 = sand.u32 (!%p1722_p9), 1, %s1636_s16  }
  0x60   : > { %s1066_s8 = sshll.u32 (!%p1722_p9), %s1854_s7, 7  ;;  %s210_s26 = scalar_lea.sflag (!%p1722_p9), [#allocation4], %s1854_s7 }
  0x61   : > { %s1858_s10 = scalar_lea.vmem (!%p1722_p9), [#allocation3], %s1066_s8  ;;  %p1984_p4 = scmp.ne.s32.totalorder (!%p1722_p9), %s1977_s21, 0 }
  0x66   : > { %1619 = dma.done.wait (%p1984_p4), %s210_s26, 2048  }
  0x67   : > { %1621 = vsyncadd (%p1984_p4), %s210_s26, 4294965248  ;;  %p1985_p5 = scmp.eq.s32.totalorder %s1702_s19, 0 }
  0x69   : > { %1623 = dma.done.wait (%p1985_p5), [#allocation7], 3072   ;;  %p1986_p9 = pmov %p1985_p5 }
  0x6a   : > { %s1069_s23 = sshll.u32 %s1854_s7, 6  ;;  %p1987_p12 = scmp.ne.s32.totalorder %s1702_s19, 0 }
  0x6b   : > { %1625 = vsyncadd (%p1986_p9), [#allocation7], 4294964224  ;;  %s1869_s27 = scalar_lea.vmem [#allocation9], %s1069_s23  ;;  %v1440_v0 = vld [vmem:[#allocation8] sm:$0xff] (!%p1987_p12)   ;;  %v1441_v1 = vld [vmem:[#allocation8 + $0x8] sm:$0xff] (!%p1987_p12)  }
  0x6c   : > { %252 = sbr.rel (%p1987_p12) target bundleno = 382 (0x17e), region = 52  ;;  %1287 = vmatprep.subr.bf16.mxu0 (!%p1987_p12), %v1440_v0  ;;  %1335 = vmatprep.subr.bf16.mxu1 (!%p1987_p12), %v1440_v0  ;;  %v1442_v2 = vld [vmem:[#allocation8 + $0x10] sm:$0xff] (!%p1987_p12)   ;;  %v1443_v3 = vld [vmem:[#allocation8 + $0x18] sm:$0xff] (!%p1987_p12)   ;;  %v1448_v4 = vld [vmem:[#allocation6] sm:$0xff] (!%p1987_p12)  }
  0x6d   : > { %1288 = vmatpush3.bf16.msra.mxu0 (!%p1987_p12), %v1440_v0  ;;  %1343 = vmatpush3.bf16.msra.mxu1 (!%p1987_p12), %v1440_v0  ;;  %v1449_v5 = vld [vmem:[#allocation6 + $0x40] sm:$0xff] (!%p1987_p12)   ;;  %v1445_v7 = vld [vmem:[#allocation8 + $0x28] sm:$0xff] (!%p1987_p12)   ;;  %v1446_v8 = vld [vmem:[#allocation8 + $0x30] sm:$0xff] (!%p1987_p12)  }
  0x6e   : > { %1289 = vmatprep.subr.bf16.mxu0 (!%p1987_p12), %v1441_v1  ;;  %1336 = vmatprep.subr.bf16.mxu1 (!%p1987_p12), %v1441_v1  ;;  %v1444_v6 = vld [vmem:[#allocation8 + $0x20] sm:$0xff] (!%p1987_p12)   ;;  %v1447_v9 = vld [vmem:[#allocation8 + $0x38] sm:$0xff] (!%p1987_p12)   ;;  %v1450_v10 = vld [vmem:[#allocation6 + $0x8] sm:$0xff] (!%p1987_p12)  }
  0x6f   : > { %1303 = vmatprep.mubr.bf16.mxu0 (!%p1987_p12), %v1448_v4  ;;  %1319 = vmatprep.mubr.bf16.mxu1 (!%p1987_p12), %v1449_v5  ;;  %v1451_v11 = vld [vmem:[#allocation6 + $0x48] sm:$0xff] (!%p1987_p12)   ;;  %v1452_v12 = vld [vmem:[#allocation6 + $0x10] sm:$0xff] (!%p1987_p12)   ;;  %v1454_v14 = vld [vmem:[#allocation6 + $0x18] sm:$0xff] (!%p1987_p12)  }
  0x70   : > { %v1453_v13 = vld [vmem:[#allocation6 + $0x50] sm:$0xff] (!%p1987_p12)   ;;  %v1455_v15 = vld [vmem:[#allocation6 + $0x58] sm:$0xff] (!%p1987_p12)   ;;  %v1456_v16 = vld [vmem:[#allocation6 + $0x20] sm:$0xff] (!%p1987_p12)  }
  0x71   : > { %1290 = vmatpush3.bf16.msra.mxu0 (!%p1987_p12), %v1441_v1  ;;  %1344 = vmatpush3.bf16.msra.mxu1 (!%p1987_p12), %v1441_v1  ;;  %v1457_v17 = vld [vmem:[#allocation6 + $0x60] sm:$0xff] (!%p1987_p12)   ;;  %v1458_v18 = vld [vmem:[#allocation6 + $0x28] sm:$0xff] (!%p1987_p12)   ;;  %v1460_v20 = vld [vmem:[#allocation6 + $0x30] sm:$0xff] (!%p1987_p12)  }
  0x72   : > { %1291 = vmatprep.subr.bf16.mxu0 (!%p1987_p12), %v1442_v2  ;;  %1337 = vmatprep.subr.bf16.mxu1 (!%p1987_p12), %v1442_v2  ;;  %v1459_v19 = vld [vmem:[#allocation6 + $0x68] sm:$0xff] (!%p1987_p12)   ;;  %v1461_v21 = vld [vmem:[#allocation6 + $0x70] sm:$0xff] (!%p1987_p12)   ;;  %v1462_v22 = vld [vmem:[#allocation6 + $0x38] sm:$0xff] (!%p1987_p12)  }
  0x73   : > { %v1463_v23 = vld [vmem:[#allocation6 + $0x78] sm:$0xff]  }
  0x75   : > { %1292 = vmatpush3.bf16.msra.mxu0 %v1442_v2  ;;  %1345 = vmatpush3.bf16.msra.mxu1 %v1442_v2 }
  0x76   : > { %1293 = vmatprep.subr.bf16.mxu0 %v1443_v3  ;;  %1338 = vmatprep.subr.bf16.mxu1 %v1443_v3 }
  0x79   : > { %1294 = vmatpush3.bf16.msra.mxu0 %v1443_v3  ;;  %1346 = vmatpush3.bf16.msra.mxu1 %v1443_v3 }
  0x7a   : > { %1295 = vmatprep.subr.bf16.mxu0 %v1444_v6  ;;  %1339 = vmatprep.subr.bf16.mxu1 %v1444_v6 }
  0x7d   : > { %1296 = vmatpush3.bf16.msra.mxu0 %v1444_v6  ;;  %1347 = vmatpush3.bf16.msra.mxu1 %v1444_v6 }
  0x7e   : > { %1297 = vmatprep.subr.bf16.mxu0 %v1445_v7  ;;  %1340 = vmatprep.subr.bf16.mxu1 %v1445_v7 }
  0x81   : > { %1298 = vmatpush3.bf16.msra.mxu0 %v1445_v7  ;;  %1348 = vmatpush3.bf16.msra.mxu1 %v1445_v7 }
  0x82   : > { %1299 = vmatprep.subr.bf16.mxu0 %v1446_v8  ;;  %1341 = vmatprep.subr.bf16.mxu1 %v1446_v8 }
  0x85   : > { %1300 = vmatpush3.bf16.msra.mxu0 %v1446_v8  ;;  %1349 = vmatpush3.bf16.msra.mxu1 %v1446_v8 }
  0x86   : > { %1301 = vmatprep.subr.bf16.mxu0 %v1447_v9  ;;  %1342 = vmatprep.subr.bf16.mxu1 %v1447_v9 }
  0x89   : > { %1302 = vmatpush3.bf16.msra.mxu0 %v1447_v9  ;;  %1350 = vmatpush3.bf16.msra.mxu1 %v1447_v9 }
  0x8c   : > { %1304 = vmatmul.mubr.bf16.vlgmr.msra.gmra.mrb[0].mxu0 %v1450_v10  ;;  %1320 = vmatmul.mubr.bf16.vlgmr.msra.gmra.mrb[0].mxu1 %v1451_v11 }
  0x8d   : > { %1307 = vmatprep.mubr.bf16.mxu0 %v1452_v12  ;;  %1323 = vmatprep.mubr.bf16.mxu1 %v1453_v13 }
  0x94   : > { %1308 = vmatmul.mubr.bf16.gmra.mrb[4].mxu0 %v1454_v14  ;;  %1324 = vmatmul.mubr.bf16.gmra.mrb[4].mxu1 %v1455_v15 }
  0x95   : > { %1311 = vmatprep.mubr.bf16.mxu0 %v1456_v16  ;;  %1327 = vmatprep.mubr.bf16.mxu1 %v1457_v17 }
  0x9c   : > { %1312 = vmatmul.mubr.bf16.gmra.mrb[8].mxu0 %v1458_v18  ;;  %1328 = vmatmul.mubr.bf16.gmra.mrb[8].mxu1 %v1459_v19 }
  0x9d   : > { %1315 = vmatprep.mubr.bf16.mxu0 %v1460_v20  ;;  %1331 = vmatprep.mubr.bf16.mxu1 %v1461_v21 }
  0xa4   : > { %1316 = vmatmul.mubr.bf16.gmra.mrb[12].mxu0 %v1462_v22  ;;  %1332 = vmatmul.mubr.bf16.gmra.mrb[12].mxu1 %v1463_v23 }
 0x15f   : > { %v1305_v24 = vpop.f32.mrb[0].mxu0  ;;  %v1321_v25 = vpop.f32.mrb[0].mxu1 }
 0x160   : > { %v479_v26 = vpop.f32.mrb[1].mxu0  ;;  %v543_v27 = vpop.f32.mrb[1].mxu1 }
 0x161   : > { %v1306_v28 = vpop.f32.mrb[2].mxu0  ;;  %v1322_v29 = vpop.f32.mrb[2].mxu1 }
 0x162   : > { %v607_v30 = vpack.c.bf16 %v1306_v28, %v1305_v24  ;;  %v615_v31 = vpack.c.bf16 %v1322_v29, %v1321_v25  ;;  %v482_v32 = vpop.f32.mrb[3].mxu0  ;;  %v546_v33 = vpop.f32.mrb[3].mxu1 }
 0x163   : > { %v606_v34 = vpack.c.bf16 %v482_v32, %v479_v26  ;;  %v614_v35 = vpack.c.bf16 %v546_v33, %v543_v27 }
 0x164   : > { %623 = vst [vmem:[#allocation2 + $0x8] sm:$0xff] %v607_v30  ;;  %631 = vst [vmem:[#allocation2 + $0x48] sm:$0xff] %v615_v31 }
 0x165   : > { %622 = vst [vmem:[#allocation2] sm:$0xff] %v606_v34  ;;  %630 = vst [vmem:[#allocation2 + $0x40] sm:$0xff] %v614_v35 }
 0x167   : > { %v1309_v36 = vpop.f32.mrb[4].mxu0  ;;  %v1325_v37 = vpop.f32.mrb[4].mxu1 }
 0x168   : > { %v495_v38 = vpop.f32.mrb[5].mxu0  ;;  %v559_v39 = vpop.f32.mrb[5].mxu1 }
 0x169   : > { %v1310_v40 = vpop.f32.mrb[6].mxu0  ;;  %v1326_v41 = vpop.f32.mrb[6].mxu1 }
 0x16a   : > { %v609_v42 = vpack.c.bf16 %v1310_v40, %v1309_v36  ;;  %v617_v43 = vpack.c.bf16 %v1326_v41, %v1325_v37  ;;  %v498_v44 = vpop.f32.mrb[7].mxu0  ;;  %v562_v45 = vpop.f32.mrb[7].mxu1 }
 0x16b   : > { %v608_v46 = vpack.c.bf16 %v498_v44, %v495_v38  ;;  %v616_v47 = vpack.c.bf16 %v562_v45, %v559_v39 }
 0x16c   : > { %625 = vst [vmem:[#allocation2 + $0x18] sm:$0xff] %v609_v42  ;;  %633 = vst [vmem:[#allocation2 + $0x58] sm:$0xff] %v617_v43 }
 0x16d   : > { %624 = vst [vmem:[#allocation2 + $0x10] sm:$0xff] %v608_v46  ;;  %632 = vst [vmem:[#allocation2 + $0x50] sm:$0xff] %v616_v47 }
 0x16f   : > { %v1313_v48 = vpop.f32.mrb[8].mxu0  ;;  %v1329_v49 = vpop.f32.mrb[8].mxu1 }
 0x170   : > { %v511_v50 = vpop.f32.mrb[9].mxu0  ;;  %v575_v51 = vpop.f32.mrb[9].mxu1 }
 0x171   : > { %v1314_v52 = vpop.f32.mrb[10].mxu0  ;;  %v1330_v53 = vpop.f32.mrb[10].mxu1 }
 0x172   : > { %v611_v54 = vpack.c.bf16 %v1314_v52, %v1313_v48  ;;  %v619_v55 = vpack.c.bf16 %v1330_v53, %v1329_v49  ;;  %v514_v56 = vpop.f32.mrb[11].mxu0  ;;  %v578_v57 = vpop.f32.mrb[11].mxu1 }
 0x173   : > { %v610_v58 = vpack.c.bf16 %v514_v56, %v511_v50  ;;  %v618_v59 = vpack.c.bf16 %v578_v57, %v575_v51 }
 0x174   : > { %627 = vst [vmem:[#allocation2 + $0x28] sm:$0xff] %v611_v54  ;;  %635 = vst [vmem:[#allocation2 + $0x68] sm:$0xff] %v619_v55 }
 0x175   : > { %626 = vst [vmem:[#allocation2 + $0x20] sm:$0xff] %v610_v58  ;;  %634 = vst [vmem:[#allocation2 + $0x60] sm:$0xff] %v618_v59 }
 0x177   : > { %v1317_v60 = vpop.f32.mrb[12].mxu0  ;;  %v1333_v61 = vpop.f32.mrb[12].mxu1 }
 0x178   : > { %v527_v62 = vpop.f32.mrb[13].mxu0  ;;  %v591_v63 = vpop.f32.mrb[13].mxu1 }
 0x179   : > { %v1318_v0 = vpop.f32.mrb[14].mxu0  ;;  %v1334_v1 = vpop.f32.mrb[14].mxu1 }
 0x17a   : > { %v613_v2 = vpack.c.bf16 %v1318_v0, %v1317_v60  ;;  %v621_v3 = vpack.c.bf16 %v1334_v1, %v1333_v61  ;;  %v530_v4 = vpop.f32.mrb[15].mxu0  ;;  %v594_v5 = vpop.f32.mrb[15].mxu1 }
 0x17b   : > { %v612_v6 = vpack.c.bf16 %v530_v4, %v527_v62  ;;  %v620_v7 = vpack.c.bf16 %v594_v5, %v591_v63 }
 0x17c   : > { %629 = vst [vmem:[#allocation2 + $0x38] sm:$0xff] %v613_v2  ;;  %637 = vst [vmem:[#allocation2 + $0x78] sm:$0xff] %v621_v3 }
 0x17d   : > { %628 = vst [vmem:[#allocation2 + $0x30] sm:$0xff] %v612_v6  ;;  %636 = vst [vmem:[#allocation2 + $0x70] sm:$0xff] %v620_v7 }
 0x17e PF: > { %v662_v8 = vld [vmem:[#allocation2 + $0x40] sm:$0xff]  ;;  %v663_v10 = vld [vmem:[#allocation2 + $0x48] sm:$0xff]  ;;  %v664_v12 = vld [vmem:[#allocation2 + $0x50] sm:$0xff]  ;;  %s1151_s5 = sshll.u32 %s1702_s19, 10  ;;  %s964_s6 = sshll.u32 %s1869_s27, 4  ;;  %s1923_s6 = int_to_ptr.vmem [resolvable:$true] %s964_s6 }
 0x17f   : > { %v654_v9 = vld [vmem:[#allocation2] sm:$0xff]  ;;  %1223 = vmatprep.subr.bf16.mxu0 %v662_v8  ;;  %1351 = vmatprep.subr.bf16.mxu1 %v662_v8  ;;  %v655_v11 = vld [vmem:[#allocation2 + $0x8] sm:$0xff]  ;;  %v656_v14 = vld [vmem:[#allocation2 + $0x10] sm:$0xff]  ;;  %s1921_s28 = scalar_lea.hbm %s1973_s4, %s1151_s5  ;;  %s951_s19 = scalar_lea.sflag [#allocation5], %s1854_s7 }
 0x180   : > { %1224 = vmatpush3.bf16.msra.mxu0 %v654_v9  ;;  %1359 = vmatpush3.bf16.msra.mxu1 %v654_v9  ;;  %v1466_v13 = vld [vmem:[%s1858_s10 + $0x4] ss:$8 sps:$4 sm:$0xff]   ;;  %v665_v16 = vld [vmem:[#allocation2 + $0x58] sm:$0xff]  ;;  %v1464_v26 = vld [vmem:[%s1858_s10] ss:$8 sps:$4 sm:$0xff]   ;;  %s1574_s11 = scalar_lea.vmem %s1923_s6, 1024 }
 0x181   : > { %1225 = vmatprep.subr.bf16.mxu0 %v663_v10  ;;  %1352 = vmatprep.subr.bf16.mxu1 %v663_v10  ;;  %v1469_v15 = vld [vmem:[%s1858_s10 + $0x44] ss:$8 sps:$4 sm:$0xff]   ;;  %v657_v17 = vld [vmem:[#allocation2 + $0x18] sm:$0xff]  ;;  %v1467_v27 = vld [vmem:[%s1858_s10 + $0x40] ss:$8 sps:$4 sm:$0xff]   ;;  %p1575_p3 = scmp.ne.s32.totalorder %s1923_s6, %s1574_s11  ;;  %p1988_p1 = scmp.ne.s32.totalorder %s1982_s13, 0 }
 0x182   : > { %789 = vmatprep.mubr.bf16.mxu0 %v1466_v13  ;;  %821 = vmatprep.mubr.bf16.mxu1 %v1469_v15  ;;  %v666_v18 = vld [vmem:[#allocation2 + $0x60] sm:$0xff]  ;;  %v667_v20 = vld [vmem:[#allocation2 + $0x68] sm:$0xff]  ;;  %v1470_v28 = vld [vmem:[%s1858_s10 + $0x14] ss:$8 sps:$4 sm:$0xff]   ;;  %s1653_s12 = smov [#allocation9]  }
 0x183   : > { %v658_v19 = vld [vmem:[#allocation2 + $0x20] sm:$0xff]  ;;  %v659_v21 = vld [vmem:[#allocation2 + $0x28] sm:$0xff]  ;;  %v669_v24 = vld [vmem:[#allocation2 + $0x78] sm:$0xff]  ;;  %p1576_p11 = pnand %p1575_p3, %p1988_p1  ;;  %s1578_s29 = sshll.u32 %s1653_s12, 4  ;;  %s1579_s29 = int_to_ptr.vmem [resolvable:$false] %s1578_s29 }
 0x184   : > { %1226 = vmatpush3.bf16.msra.mxu0 %v655_v11  ;;  %1360 = vmatpush3.bf16.msra.mxu1 %v655_v11  ;;  %v668_v22 = vld [vmem:[#allocation2 + $0x70] sm:$0xff]  ;;  %v661_v25 = vld [vmem:[#allocation2 + $0x38] sm:$0xff]  ;;  %v1476_v32 = vld [vmem:[%s1858_s10 + $0x24] ss:$8 sps:$4 sm:$0xff]   ;;  %s1580_s25 = scalar_lea.vmem %s1579_s29, 2048  ;;  %p1581_p10 = scmp.lt.s32.totalorder %s1923_s6, %s1579_s29 }
 0x185   : > { %1227 = vmatprep.subr.bf16.mxu0 %v664_v12  ;;  %1353 = vmatprep.subr.bf16.mxu1 %v664_v12  ;;  %v660_v23 = vld [vmem:[#allocation2 + $0x30] sm:$0xff]  ;;  %v1478_v33 = vld [vmem:[%s1858_s10 + $0x64] ss:$8 sps:$4 sm:$0xff]   ;;  %v1480_v34 = vld [vmem:[%s1858_s10 + $0x20] ss:$8 sps:$4 sm:$0xff]   ;;  %p1577_p7 = pneg %p1576_p11  ;;  %p1582_p13 = scmp.lt.s32.totalorder %s1580_s25, %s1574_s11 }
 0x186   : > { %v1472_v29 = vld [vmem:[%s1858_s10 + $0x54] ss:$8 sps:$4 sm:$0xff]   ;;  %v1474_v30 = vld [vmem:[%s1858_s10 + $0x10] ss:$8 sps:$4 sm:$0xff]   ;;  %v1481_v35 = vld [vmem:[%s1858_s10 + $0x60] ss:$8 sps:$4 sm:$0xff]  }
 0x187   : > { %v1475_v31 = vld [vmem:[%s1858_s10 + $0x50] ss:$8 sps:$4 sm:$0xff]   ;;  %v1482_v36 = vld [vmem:[%s1858_s10 + $0x34] ss:$8 sps:$4 sm:$0xff]   ;;  %v1892_v42 = vld [vmem:[%s1972_s3] ss:$0 sm:$0xff]  ;;  %p1583_p2 = por %p1582_p13, %p1581_p10 }
 0x188   : > { %1228 = vmatpush3.bf16.msra.mxu0 %v656_v14  ;;  %1361 = vmatpush3.bf16.msra.mxu1 %v656_v14  ;;  %v1484_v37 = vld [vmem:[%s1858_s10 + $0x74] ss:$8 sps:$4 sm:$0xff]   ;;  %v1486_v38 = vld [vmem:[%s1858_s10 + $0x30] ss:$8 sps:$4 sm:$0xff]  }
 0x189   : > { %1229 = vmatprep.subr.bf16.mxu0 %v665_v16  ;;  %1354 = vmatprep.subr.bf16.mxu1 %v665_v16  ;;  %v1487_v39 = vld [vmem:[%s1858_s10 + $0x70] ss:$8 sps:$4 sm:$0xff]   ;;  %p1584_p0 = pnand %p1583_p2, %p1577_p7 }
 0x18c   : > { %1230 = vmatpush3.bf16.msra.mxu0 %v657_v17  ;;  %1362 = vmatpush3.bf16.msra.mxu1 %v657_v17 }
 0x18d   : > { %1231 = vmatprep.subr.bf16.mxu0 %v666_v18  ;;  %1355 = vmatprep.subr.bf16.mxu1 %v666_v18 }
 0x190   : > { %1232 = vmatpush3.bf16.msra.mxu0 %v658_v19  ;;  %1363 = vmatpush3.bf16.msra.mxu1 %v658_v19 }
 0x191   : > { %1233 = vmatprep.subr.bf16.mxu0 %v667_v20  ;;  %1356 = vmatprep.subr.bf16.mxu1 %v667_v20 }
 0x194   : > { %1234 = vmatpush3.bf16.msra.mxu0 %v659_v21  ;;  %1364 = vmatpush3.bf16.msra.mxu1 %v659_v21 }
 0x195   : > { %1235 = vmatprep.subr.bf16.mxu0 %v668_v22  ;;  %1357 = vmatprep.subr.bf16.mxu1 %v668_v22 }
 0x198   : > { %1236 = vmatpush3.bf16.msra.mxu0 %v660_v23  ;;  %1365 = vmatpush3.bf16.msra.mxu1 %v660_v23 }
 0x199   : > { %1237 = vmatprep.subr.bf16.mxu0 %v669_v24  ;;  %1358 = vmatprep.subr.bf16.mxu1 %v669_v24 }
 0x19c   : > { %1238 = vmatpush3.bf16.msra.mxu0 %v661_v25  ;;  %1366 = vmatpush3.bf16.msra.mxu1 %v661_v25 }
 0x19f   : > { %790 = vmatmul.mubr.bf16.vlgmr.msra.gmra.mrb[0].mxu0 %v1464_v26  ;;  %822 = vmatmul.mubr.bf16.vlgmr.msra.gmra.mrb[0].mxu1 %v1467_v27 }
 0x1a0   : > { %797 = vmatprep.mubr.bf16.mxu0 %v1470_v28  ;;  %829 = vmatprep.mubr.bf16.mxu1 %v1472_v29 }
 0x1a7   : > { %798 = vmatmul.mubr.bf16.gmra.mrb[4].mxu0 %v1474_v30  ;;  %830 = vmatmul.mubr.bf16.gmra.mrb[4].mxu1 %v1475_v31 }
 0x1a8   : > { %805 = vmatprep.mubr.bf16.mxu0 %v1476_v32  ;;  %837 = vmatprep.mubr.bf16.mxu1 %v1478_v33 }
 0x1af   : > { %806 = vmatmul.mubr.bf16.gmra.mrb[8].mxu0 %v1480_v34  ;;  %838 = vmatmul.mubr.bf16.gmra.mrb[8].mxu1 %v1481_v35 }
 0x1b0   : > { %813 = vmatprep.mubr.bf16.mxu0 %v1482_v36  ;;  %845 = vmatprep.mubr.bf16.mxu1 %v1484_v37 }
 0x1b7   : > { %814 = vmatmul.mubr.bf16.gmra.mrb[12].mxu0 %v1486_v38  ;;  %846 = vmatmul.mubr.bf16.gmra.mrb[12].mxu1 %v1487_v39 }
 0x272   : > { %v1239_v40 = vpop.f32.mrb[0].mxu0  ;;  %v1263_v41 = vpop.f32.mrb[0].mxu1 }
 0x273   : > { %v1240_v43 = vpop.f32.mrb[1].mxu0  ;;  %v1264_v44 = vpop.f32.mrb[1].mxu1 }
 0x274   : > { %v1241_v45 = vadd.f32 %v1240_v43, %v1239_v40  ;;  %v1265_v46 = vadd.f32 %v1264_v44, %v1263_v41  ;;  %v1242_v47 = vpop.f32.mrb[2].mxu0  ;;  %v1266_v48 = vpop.f32.mrb[2].mxu1 }
 0x275   : > { %v1243_v49 = vpop.f32.mrb[3].mxu0  ;;  %v1267_v50 = vpop.f32.mrb[3].mxu1 }
 0x276   : > { %v792_v51 = vadd.f32 %v1241_v45, %v1892_v42  ;;  %v824_v52 = vadd.f32 %v1265_v46, %v1892_v42  ;;  %v1244_v53 = vadd.f32 %v1243_v49, %v1242_v47  ;;  %v1268_v54 = vadd.f32 %v1267_v50, %v1266_v48 }
 0x278   : > { %v795_v55 = vadd.f32 %v1244_v53, %v1892_v42  ;;  %v827_v56 = vadd.f32 %v1268_v54, %v1892_v42  ;;  %v854_v57 = vmax.f32 %v792_v51, 0.0  ;;  %v862_v58 = vmax.f32 %v824_v52, 0.0 }
 0x27a   : > { %v855_v59 = vmax.f32 %v795_v55, 0.0  ;;  %v863_v60 = vmax.f32 %v827_v56, 0.0  ;;  %v1245_v61 = vpop.f32.mrb[4].mxu0  ;;  %v1269_v62 = vpop.f32.mrb[4].mxu1 }
 0x27b   : > { %v1246_v63 = vpop.f32.mrb[5].mxu0  ;;  %v1270_v0 = vpop.f32.mrb[5].mxu1 }
 0x27c   : > { %v1155_v1 = vpack.c.bf16 %v855_v59, %v854_v57  ;;  %v1175_v2 = vpack.c.bf16 %v863_v60, %v862_v58  ;;  %v1247_v3 = vadd.f32 %v1246_v63, %v1245_v61  ;;  %v1271_v4 = vadd.f32 %v1270_v0, %v1269_v62  ;;  %v1248_v5 = vpop.f32.mrb[6].mxu0  ;;  %v1272_v6 = vpop.f32.mrb[6].mxu1 }
 0x27d   : > { %v1249_v7 = vpop.f32.mrb[7].mxu0  ;;  %v1273_v8 = vpop.f32.mrb[7].mxu1 }
 0x27e   : > { %1156 = vst [vmem:[%s1869_s27] sm:$0xff] %v1155_v1   ;;  %1195 = vst [vmem:[%s1869_s27 + $0x20] sm:$0xff] %v1175_v2   ;;  %v800_v9 = vadd.f32 %v1247_v3, %v1892_v42  ;;  %v832_v10 = vadd.f32 %v1271_v4, %v1892_v42  ;;  %v1250_v11 = vadd.f32 %v1249_v7, %v1248_v5 }
 0x27f   : > { %v1274_v12 = vadd.f32 %v1273_v8, %v1272_v6 }
 0x280   : > { %v803_v13 = vadd.f32 %v1250_v11, %v1892_v42  ;;  %v856_v15 = vmax.f32 %v800_v9, 0.0  ;;  %v864_v16 = vmax.f32 %v832_v10, 0.0 }
 0x281   : > { %v835_v14 = vadd.f32 %v1274_v12, %v1892_v42 }
 0x282   : > { %v857_v17 = vmax.f32 %v803_v13, 0.0  ;;  %v1251_v19 = vpop.f32.mrb[8].mxu0  ;;  %v1275_v20 = vpop.f32.mrb[8].mxu1 }
 0x283   : > { %v865_v18 = vmax.f32 %v835_v14, 0.0  ;;  %v1252_v21 = vpop.f32.mrb[9].mxu0  ;;  %v1276_v22 = vpop.f32.mrb[9].mxu1 }
 0x284   : > { %v1160_v23 = vpack.c.bf16 %v857_v17, %v856_v15  ;;  %v1253_v25 = vadd.f32 %v1252_v21, %v1251_v19  ;;  %v1277_v26 = vadd.f32 %v1276_v22, %v1275_v20  ;;  %v1254_v27 = vpop.f32.mrb[10].mxu0  ;;  %v1278_v28 = vpop.f32.mrb[10].mxu1 }
 0x285   : > { %v1180_v24 = vpack.c.bf16 %v865_v18, %v864_v16  ;;  %v1255_v29 = vpop.f32.mrb[11].mxu0  ;;  %v1279_v30 = vpop.f32.mrb[11].mxu1 }
 0x286   : > { %1192 = vst [vmem:[%s1869_s27 + $0x8] sm:$0xff] %v1160_v23   ;;  %v808_v31 = vadd.f32 %v1253_v25, %v1892_v42  ;;  %v840_v32 = vadd.f32 %v1277_v26, %v1892_v42  ;;  %v1256_v33 = vadd.f32 %v1255_v29, %v1254_v27  ;;  %v1280_v34 = vadd.f32 %v1279_v30, %v1278_v28 }
 0x287   : > { %1196 = vst [vmem:[%s1869_s27 + $0x28] sm:$0xff] %v1180_v24  }
 0x288   : > { %v811_v35 = vadd.f32 %v1256_v33, %v1892_v42  ;;  %v843_v36 = vadd.f32 %v1280_v34, %v1892_v42  ;;  %v858_v37 = vmax.f32 %v808_v31, 0.0  ;;  %v866_v38 = vmax.f32 %v840_v32, 0.0 }
 0x28a   : > { %v859_v39 = vmax.f32 %v811_v35, 0.0  ;;  %v867_v40 = vmax.f32 %v843_v36, 0.0  ;;  %v1257_v41 = vpop.f32.mrb[12].mxu0  ;;  %v1281_v43 = vpop.f32.mrb[12].mxu1 }
 0x28b   : > { %v1258_v44 = vpop.f32.mrb[13].mxu0  ;;  %v1282_v45 = vpop.f32.mrb[13].mxu1 }
 0x28c   : > { %v1165_v46 = vpack.c.bf16 %v859_v39, %v858_v37  ;;  %v1185_v47 = vpack.c.bf16 %v867_v40, %v866_v38  ;;  %v1259_v48 = vadd.f32 %v1258_v44, %v1257_v41  ;;  %v1283_v49 = vadd.f32 %v1282_v45, %v1281_v43  ;;  %v1260_v50 = vpop.f32.mrb[14].mxu0  ;;  %v1284_v51 = vpop.f32.mrb[14].mxu1 }
 0x28d   : > { %v1261_v52 = vpop.f32.mrb[15].mxu0  ;;  %v1285_v53 = vpop.f32.mrb[15].mxu1 }
 0x28e   : > { %1193 = vst [vmem:[%s1869_s27 + $0x10] sm:$0xff] %v1165_v46   ;;  %1197 = vst [vmem:[%s1869_s27 + $0x30] sm:$0xff] %v1185_v47   ;;  %v816_v54 = vadd.f32 %v1259_v48, %v1892_v42  ;;  %v848_v55 = vadd.f32 %v1283_v49, %v1892_v42  ;;  %v1262_v56 = vadd.f32 %v1261_v52, %v1260_v50 }
 0x28f   : > { %v1286_v57 = vadd.f32 %v1285_v53, %v1284_v51 }
 0x290   : > { %v819_v58 = vadd.f32 %v1262_v56, %v1892_v42  ;;  %v860_v60 = vmax.f32 %v816_v54, 0.0  ;;  %v868_v61 = vmax.f32 %v848_v55, 0.0 }
 0x291   : > { %v851_v59 = vadd.f32 %v1286_v57, %v1892_v42 }
 0x292   : > { %v861_v62 = vmax.f32 %v819_v58, 0.0 }
 0x293   : > { %v869_v63 = vmax.f32 %v851_v59, 0.0 }
 0x294   : > { %v1170_v0 = vpack.c.bf16 %v861_v62, %v860_v60 }
 0x295   : > { %v1190_v1 = vpack.c.bf16 %v869_v63, %v868_v61 }
 0x296   : > { %1194 = vst [vmem:[%s1869_s27 + $0x18] sm:$0xff] %v1170_v0  }
 0x297   : > { %1198 = vst [vmem:[%s1869_s27 + $0x38] sm:$0xff] %v1190_v1  }
 0x298   : > { %1587 = shalt.err (!%p1584_p0)
}
 0x299   : > { %s1588_s8 = scalar_lea.hbm %s1921_s28, 1024  ;;  %s1592_s23 = scalar_lea.hbm %s1973_s4, 2048 }
 0x29a   : > { %p1589_p6 = scmp.ne.s32.totalorder %s1921_s28, %s1588_s8  ;;  %p1593_p5 = scmp.lt.u32.totalorder %s1921_s28, %s1973_s4 }
 0x29b   : > { %p1594_p9 = scmp.lt.u32.totalorder %s1592_s23, %s1588_s8  ;;  %p1596_p3 = scmp.lt.u32.totalorder %s1588_s8, %s1921_s28 }
 0x29c   : > { %p1590_p8 = pnand %p1589_p6, %p1988_p1 }
 0x29d   : > { %p1595_p12 = por %p1594_p9, %p1593_p5 }
 0x29e   : > { %p1591_p4 = pneg %p1590_p8 }
 0x29f   : > { %p1597_p11 = por %p1596_p3, %p1595_p12 }
 0x2a1   : > { %p1598_p7 = pnand %p1597_p11, %p1591_p4 }
 0x2a3   : > { %1601 = shalt.err (!%p1598_p7)
}
 0x2a4   : > { %s1654_s30 = smov 64   ;;  %s1655_s5 = smov 4  }
 0x2a5   : > { %1377 = dma.vmem_to_hbm [thread:$0]  (%p1988_p1), %s1923_s6, 1024, %s1921_s28, %s951_s19, %s1654_s30, %s1654_s30, %s1655_s5  }
 0x2a6 PF: > { %s979_s24 = sand.u32 1, %s1632_s15   ;;  %p1989_p10 = scmp.ne.s32.totalorder %s1978_s22, 0 }
 0x2a7   : > { %p1990_p13 = scmp.ge.s32.totalorder %s1644_s18, 2  ;;  %s980_s20 = scalar_lea.sflag [#allocation5], %s979_s24 }
 0x2a9   : > { %p1391_p2 = pnand %p1990_p13, %p1989_p10 }
 0x2ab   : > { %1627 = dma.done.wait (!%p1391_p2), %s980_s20, 1024  }
 0x2ac   : > { %1629 = vsyncadd (!%p1391_p2), %s980_s20, 4294966272  ;;  %p18_p0 = scmp.ge.s32.totalorder %s1792_s9, 4   ;;  %s1991_s15 = smov %s1636_s16 }
 0x2ad   : > { %s1992_s16 = smov %s1640_s17  ;;  %s1993_s17 = smov %s1808_s14 }
 0x2ae   : > { %s1994_s18 = smov %s1792_s9  ;;  %20 = sbr.rel (!%p18_p0) target bundleno = 6 (0x6), region = 93 }
 0x2b5   :  { %985 = vsyncpa [#allocation4], 1 }
 0x2b6   :  { %987 = vsyncpa [#allocation4 + $0x1], 1 }
 0x2b7   :  { %988 = vsyncpa [#allocation7], 1 }
 0x2b8   :  { %989 = vsyncpa [#allocation5], 1 }
 0x2b9   :  { %991 = vsyncpa [#allocation5 + $0x1], 1 }

</bundles_post_ra>
